<compile_context>
chip_gen: v7x
topology: tpu7x:2x2x1
jax: 0.10.0
libtpu: 0.0.40
codegen_flags: <defaults>
</compile_context>

<pallas_src>
import functools

import numpy as np
import jax
import jax.numpy as jnp
from jax.experimental import pallas as pl
from jax.experimental.pallas import tpu as pltpu

_EPS = 1e-5        # nn.InstanceNorm2d default eps
_SLOPE = 0.2       # LeakyReLU negative slope

_CP = pltpu.CompilerParams(dimension_semantics=("parallel",))


# ----------------------------- in-kernel helpers ---------------------------

def _in_lrelu(x):
    # InstanceNorm2d(affine=False, biased variance, eps=1e-5) over the spatial (lane)
    # axis, then LeakyReLU(0.2).  x: (C, H*W) f32.
    mean = jnp.mean(x, axis=1, keepdims=True)
    var = jnp.mean((x - mean) * (x - mean), axis=1, keepdims=True)
    y = (x - mean) * jax.lax.rsqrt(var + _EPS)
    return jnp.where(y > 0, y, _SLOPE * y)


def _shift_flat(x, s, hw):
    # out[:, p] = x[:, (p + s) mod hw]; wrapped entries are masked by the caller.
    k = (-s) % hw
    if k == 0:
        return x
    return jnp.concatenate([x[:, hw - k:], x[:, :hw - k]], axis=1)


def _conv3x3(x, w2, b, H, W):
    # 3x3, stride 1, zero-pad 1 conv on the flattened-spatial layout.
    #   x : (Cin, H*W)
    #   w2: (Cout, 9*Cin), column index = ((ky*3 + kx) * Cin + ci)
    #   b : (Cout, 1)
    # Returns (Cout, H*W) f32.  Boundary handling is done with in-VMEM masks
    # (no padded copy of the input is ever materialized in HBM).
    assert W > 0 and (W & (W - 1)) == 0, "W must be a power of two"
    _, HW = x.shape
    logw = int(round(np.log2(W)))
    p = jax.lax.broadcasted_iota(jnp.int32, (1, HW), 1)
    row = p >> logw
    col = p & (W - 1)

    taps = []
    for dy in (-1, 0, 1):
        for dx in (-1, 0, 1):
            z = _shift_flat(x, dy * W + dx, HW)
            m = None
            if dy == -1:
                m = row >= 1
            elif dy == 1:
                m = row <= H - 2
            if dx == -1:
                m = (col >= 1) if m is None else (m & (col >= 1))
            elif dx == 1:
                m = (col <= W - 2) if m is None else (m & (col <= W - 2))
            if m is not None:
                z = jnp.where(m, z, 0.0)
            taps.append(z)

    zall = jnp.concatenate(taps, axis=0)                        # (9*Cin, H*W)
    return jnp.dot(w2, zall, preferred_element_type=jnp.float32) + b


def _conv3x3_in_lrelu(x, w2, b, H, W):
    return _in_lrelu(_conv3x3(x, w2, b, H, W))


# ----------------------------- kernel bodies -------------------------------

def _make_init_kernel(C, H, W):
    # Linear -> reshape(C,H,W) -> IN -> LReLU -> Conv3x3 -> IN -> LReLU, one sample.
    def kernel(x_ref, lw_ref, lb_ref, cw_ref, cb_ref, o_ref, h_scr):
        xv = x_ref[0]                                           # (1, in_f)
        for c in range(C):
            h_scr[pl.ds(c, 1), :] = jnp.dot(
                xv, lw_ref[c], preferred_element_type=jnp.float32)
        h = h_scr[...] + lb_ref[...]                            # (C, H*W)
        h = _in_lrelu(h)
        h = _conv3x3_in_lrelu(h, cw_ref[...], cb_ref[...], H, W)
        o_ref[0] = h
    return kernel


def _make_level_kernel(H_out, W_out):
    # bilinear 2x up -> Conv3x3+IN+LReLU -> Conv3x3+IN+LReLU, one sample.
    def kernel(x_ref, up_ref, w1_ref, b1_ref, w2_ref, b2_ref, o_ref):
        x = x_ref[0]                                            # (Cin, HW_in)
        xu = jnp.dot(x, up_ref[...], preferred_element_type=jnp.float32)
        h = _conv3x3_in_lrelu(xu, w1_ref[...], b1_ref[...], H_out, W_out)
        h = _conv3x3_in_lrelu(h, w2_ref[...], b2_ref[...], H_out, W_out)
        o_ref[0] = h
    return kernel


def _make_final_kernel(H_out, W_out, blend):
    # Last level block + toRGB(out_level) [+ toRGB(out_level-1), nearest 2x, blend].
    def kernel(*refs):
        if blend:
            (alpha_ref, x_ref, up_ref, near_ref, w1_ref, b1_ref, w2_ref, b2_ref,
             wrp_ref, brp_ref, wr_ref, br_ref, o_ref) = refs
        else:
            (x_ref, up_ref, w1_ref, b1_ref, w2_ref, b2_ref,
             wr_ref, br_ref, o_ref) = refs
        x = x_ref[0]                                            # (Cin, HW_in)
        xu = jnp.dot(x, up_ref[...], preferred_element_type=jnp.float32)
        h = _conv3x3_in_lrelu(xu, w1_ref[...], b1_ref[...], H_out, W_out)
        h = _conv3x3_in_lrelu(h, w2_ref[...], b2_ref[...], H_out, W_out)
        rgb = jnp.dot(wr_ref[...], h, preferred_element_type=jnp.float32) + br_ref[...]
        if blend:
            prev = (jnp.dot(wrp_ref[...], x, preferred_element_type=jnp.float32)
                    + brp_ref[...])                             # (Crgb, HW_in)
            prev_up = jnp.dot(prev, near_ref[...],
                              preferred_element_type=jnp.float32)
            a = alpha_ref[0, 0]
            rgb = a * rgb + (1.0 - a) * prev_up
        o_ref[0] = rgb
    return kernel


def _rgb_kernel(x_ref, w_ref, b_ref, o_ref):
    o_ref[0] = (jnp.dot(w_ref[...], x_ref[0], preferred_element_type=jnp.float32)
                + b_ref[...])


# ----------------------------- pallas_call wrappers ------------------------

def _full_spec(shape):
    n = len(shape)
    return pl.BlockSpec(tuple(shape), lambda i, n=n: (0,) * n)


def _sample_spec(shape):
    blk = (1,) + tuple(shape[1:])
    n = len(shape)
    return pl.BlockSpec(blk, lambda i, n=n: (i,) + (0,) * (n - 1))


def _call_init(x3, lw, lb, cw, cb, C, H, W):
    N = x3.shape[0]
    HW = H * W
    return pl.pallas_call(
        _make_init_kernel(C, H, W),
        grid=(N,),
        in_specs=[_sample_spec(x3.shape), _full_spec(lw.shape), _full_spec(lb.shape),
                  _full_spec(cw.shape), _full_spec(cb.shape)],
        out_specs=pl.BlockSpec((1, C, HW), lambda i: (i, 0, 0)),
        out_shape=jax.ShapeDtypeStruct((N, C, HW), jnp.float32),
        scratch_shapes=[pltpu.VMEM((C, HW), jnp.float32)],
        compiler_params=_CP,
    )(x3, lw, lb, cw, cb)


def _call_level(h, up, w1, b1, w2, b2, H_out, W_out):
    N = h.shape[0]
    Cout = w1.shape[0]
    HWo = H_out * W_out
    return pl.pallas_call(
        _make_level_kernel(H_out, W_out),
        grid=(N,),
        in_specs=[_sample_spec(h.shape), _full_spec(up.shape),
                  _full_spec(w1.shape), _full_spec(b1.shape),
                  _full_spec(w2.shape), _full_spec(b2.shape)],
        out_specs=pl.BlockSpec((1, Cout, HWo), lambda i: (i, 0, 0)),
        out_shape=jax.ShapeDtypeStruct((N, Cout, HWo), jnp.float32),
        compiler_params=_CP,
    )(h, up, w1, b1, w2, b2)


def _call_final(h, up, w1, b1, w2, b2, wr, br, H_out, W_out):
    N = h.shape[0]
    Crgb = wr.shape[0]
    HWo = H_out * W_out
    return pl.pallas_call(
        _make_final_kernel(H_out, W_out, blend=False),
        grid=(N,),
        in_specs=[_sample_spec(h.shape), _full_spec(up.shape),
                  _full_spec(w1.shape), _full_spec(b1.shape),
                  _full_spec(w2.shape), _full_spec(b2.shape),
                  _full_spec(wr.shape), _full_spec(br.shape)],
        out_specs=pl.BlockSpec((1, Crgb, HWo), lambda i: (i, 0, 0)),
        out_shape=jax.ShapeDtypeStruct((N, Crgb, HWo), jnp.float32),
        compiler_params=_CP,
    )(h, up, w1, b1, w2, b2, wr, br)


def _call_final_blend(alpha_arr, h, up, near, w1, b1, w2, b2, wrp, brp, wr, br,
                      H_out, W_out):
    N = h.shape[0]
    Crgb = wr.shape[0]
    HWo = H_out * W_out
    smem_spec = pl.BlockSpec(memory_space=pltpu.MemorySpace.SMEM)
    return pl.pallas_call(
        _make_final_kernel(H_out, W_out, blend=True),
        grid=(N,),
        in_specs=[smem_spec, _sample_spec(h.shape), _full_spec(up.shape),
                  _full_spec(near.shape),
                  _full_spec(w1.shape), _full_spec(b1.shape),
                  _full_spec(w2.shape), _full_spec(b2.shape),
                  _full_spec(wrp.shape), _full_spec(brp.shape),
                  _full_spec(wr.shape), _full_spec(br.shape)],
        out_specs=pl.BlockSpec((1, Crgb, HWo), lambda i: (i, 0, 0)),
        out_shape=jax.ShapeDtypeStruct((N, Crgb, HWo), jnp.float32),
        compiler_params=_CP,
    )(alpha_arr, h, up, near, w1, b1, w2, b2, wrp, brp, wr, br)


def _call_rgb(h, w, b):
    N, _, HW = h.shape
    Crgb = w.shape[0]
    return pl.pallas_call(
        _rgb_kernel,
        grid=(N,),
        in_specs=[_sample_spec(h.shape), _full_spec(w.shape), _full_spec(b.shape)],
        out_specs=pl.BlockSpec((1, Crgb, HW), lambda i: (i, 0, 0)),
        out_shape=jax.ShapeDtypeStruct((N, Crgb, HW), jnp.float32),
        compiler_params=_CP,
    )(h, w, b)


# ----------------------------- host-side constants -------------------------

def _bilinear_1d(n):
    # PyTorch F.interpolate(scale_factor=2, mode='bilinear', align_corners=False).
    A = np.zeros((2 * n, n), np.float32)
    for i in range(2 * n):
        src = max((i + 0.5) * 0.5 - 0.5, 0.0)
        i0 = int(np.floor(src))
        i1 = min(i0 + 1, n - 1)
        lam = src - i0
        A[i, i0] += 1.0 - lam
        A[i, i1] += lam
    return A


def _nearest_1d(n):
    # PyTorch F.interpolate(scale_factor=2)  (default mode='nearest').
    A = np.zeros((2 * n, n), np.float32)
    for i in range(2 * n):
        A[i, i // 2] = 1.0
    return A


@functools.lru_cache(maxsize=None)
def _bilinear_up_matrix_T(H, W):
    return np.kron(_bilinear_1d(H), _bilinear_1d(W)).T.copy()   # (H*W, 4*H*W)


@functools.lru_cache(maxsize=None)
def _nearest_up_matrix_T(H, W):
    return np.kron(_nearest_1d(H), _nearest_1d(W)).T.copy()     # (H*W, 4*H*W)


# ----------------------------- parameters ----------------------------------

def init_params(key, start_level, end_level, input_size, output_channels, channels):
    init_size = 2 ** start_level
    HW0 = init_size * init_size
    keys = iter(jax.random.split(key, 64))
    nrm = lambda k, s: jax.random.normal(k, s, jnp.float32)
    p = {}

    # init Linear(input_size -> HW0 * C0), gain=1, c = sqrt(2 / in_features)
    C0 = channels[start_level]
    w = nrm(next(keys), (HW0 * C0, input_size)) * np.sqrt(2.0 / input_size)
    p["lin_w"] = jnp.transpose(w.reshape(C0, HW0, input_size), (0, 2, 1))  # (C0,in,HW0)
    p["lin_b"] = jnp.zeros((C0, HW0), jnp.float32)

    def conv3x3_prep(k, cin, cout):
        w = nrm(k, (cout, cin, 3, 3)) * np.sqrt(2.0 / (9 * cin))
        # (cout, cin, ky, kx) -> (cout, ky, kx, cin) -> (cout, 9*cin)
        return jnp.transpose(w, (0, 2, 3, 1)).reshape(cout, 9 * cin)

    p["init_conv_w"] = conv3x3_prep(next(keys), C0, C0)
    p["init_conv_b"] = jnp.zeros((C0, 1), jnp.float32)

    p["blocks"] = {}
    for level in range(start_level, end_level):
        ci, co = channels[level], channels[level + 1]
        p["blocks"][level] = dict(
            w1=conv3x3_prep(next(keys), ci, co), b1=jnp.zeros((co, 1), jnp.float32),
            w2=conv3x3_prep(next(keys), co, co), b2=jnp.zeros((co, 1), jnp.float32),
        )

    p["rgb"] = {}
    for level in range(start_level, end_level + 1):
        ci = channels[level]
        w = nrm(next(keys), (output_channels, ci, 1, 1)) * np.sqrt(2.0 / ci)
        p["rgb"][level] = dict(w=w.reshape(output_channels, ci),
                               b=jnp.zeros((output_channels, 1), jnp.float32))
    return p


# ----------------------------- G.forward -----------------------------------

def g_forward(x, params, *, start_level, out_level, alpha):
    N = x.shape[0]
    H0 = 2 ** start_level
    C0 = params["lin_w"].shape[0]
    Crgb = params["rgb"][out_level]["w"].shape[0]

    # init block (Linear + IN + LReLU + Conv3x3 + IN + LReLU) — one fused kernel.
    x3 = x.reshape(N, 1, x.shape[1])
    h = _call_init(x3, params["lin_w"], params["lin_b"],
                   params["init_conv_w"], params["init_conv_b"], C0, H0, H0)

    if out_level == start_level:
        rgb = _call_rgb(h, params["rgb"][out_level]["w"], params["rgb"][out_level]["b"])
        return rgb.reshape(N, Crgb, H0, H0)

    # intermediate levels — one fused kernel each.
    for level in range(start_level, out_level - 1):
        Hi = 2 ** level
        Ho = 2 * Hi
        blk = params["blocks"][level]
        up = jnp.asarray(_bilinear_up_matrix_T(Hi, Hi))
        h = _call_level(h, up, blk["w1"], blk["b1"], blk["w2"], blk["b2"], Ho, Ho)

    # last level block fused with toRGB (and the alpha blend path when 0 < alpha < 1).
    level = out_level - 1
    Hi = 2 ** level
    Ho = 2 * Hi
    blk = params["blocks"][level]
    up = jnp.asarray(_bilinear_up_matrix_T(Hi, Hi))
    rgb_new = params["rgb"][out_level]

    if 0 < alpha < 1:
        near = jnp.asarray(_nearest_up_matrix_T(Hi, Hi))
        rgb_prev = params["rgb"][out_level - 1]
        alpha_arr = jnp.full((1, 1), alpha, jnp.float32)      # SMEM scalar operand
        rgb = _call_final_blend(alpha_arr, h, up, near,
                                blk["w1"], blk["b1"], blk["w2"], blk["b2"],
                                rgb_prev["w"], rgb_prev["b"],
                                rgb_new["w"], rgb_new["b"], Ho, Ho)
    else:
        rgb = _call_final(h, up, blk["w1"], blk["b1"], blk["w2"], blk["b2"],
                          rgb_new["w"], rgb_new["b"], Ho, Ho)

    return rgb.reshape(N, Crgb, Ho, Ho)                       # NCHW, same as PyTorch


# ----------------------------- demo ----------------------------------------

if __name__ == "__main__":
    start_level = 3
    end_level = 5
    input_size = 32
    output_channels = 6
    channels = [0, 0, 0, 8, 8, 8]          # indices start_level .. end_level used
    batch = 2

    key = jax.random.PRNGKey(0)
    kp, kx = jax.random.split(key)
    params = init_params(kp, start_level, end_level, input_size, output_channels,
                         channels)
    x = jax.random.normal(kx, (batch, input_size), jnp.float32)

    out = g_forward(x, params, start_level=start_level, out_level=end_level, alpha=0.5)
    out = jax.block_until_ready(out)
    assert out.shape == (batch, output_channels, 2 ** end_level, 2 ** end_level), out.shape
    assert bool(jnp.all(jnp.isfinite(out)))
    print("KERNEL_OK")
</pallas_src>

<mosaic_0001>
module attributes {stable_mosaic.version = 11 : i64} {
  func.func @kernel(%arg0: i32, %arg1: memref<1x1x32xf32, #tpu.memory_space<vmem>>, %arg2: memref<8x32x64xf32, #tpu.memory_space<vmem>>, %arg3: memref<8x64xf32, #tpu.memory_space<vmem>>, %arg4: memref<8x72xf32, #tpu.memory_space<vmem>>, %arg5: memref<8x1xf32, #tpu.memory_space<vmem>>, %arg6: memref<1x8x64xf32, #tpu.memory_space<vmem>>, %arg7: memref<8x64xf32, #tpu.memory_space<vmem>>) attributes {dimension_semantics = [#tpu.dimension_semantics<parallel>], iteration_bounds = array<i64: 2>, scalar_prefetch = 0 : i64, scratch_operands = 1 : i64, tpu.core_type = #tpu.core_type<tc>, window_params = [{transform_indices = @transform_0, window_bounds = array<i64: 1, 1, 32>}, {pipeline_mode = #tpu.pipeline_mode<synchronous>, transform_indices = @transform_1, window_bounds = array<i64: 8, 32, 64>}, {pipeline_mode = #tpu.pipeline_mode<synchronous>, transform_indices = @transform_2, window_bounds = array<i64: 8, 64>}, {pipeline_mode = #tpu.pipeline_mode<synchronous>, transform_indices = @transform_3, window_bounds = array<i64: 8, 72>}, {pipeline_mode = #tpu.pipeline_mode<synchronous>, transform_indices = @transform_4, window_bounds = array<i64: 8, 1>}, {transform_indices = @transform_5, window_bounds = array<i64: 1, 8, 64>}]} {
    %c0 = arith.constant 0 : index
    %c0_0 = arith.constant 0 : index
    %c0_1 = arith.constant 0 : index
    %0 = vector.load %arg1[%c0, %c0_0, %c0_1] : memref<1x1x32xf32, #tpu.memory_space<vmem>>, vector<1x1x32xf32>
    %1 = vector.shape_cast %0 : vector<1x1x32xf32> to vector<1x32xf32>
    %c0_2 = arith.constant 0 : index
    %c0_3 = arith.constant 0 : index
    %c0_4 = arith.constant 0 : index
    %2 = vector.load %arg2[%c0_2, %c0_3, %c0_4] : memref<8x32x64xf32, #tpu.memory_space<vmem>>, vector<1x32x64xf32>
    %3 = vector.shape_cast %2 : vector<1x32x64xf32> to vector<32x64xf32>
    %cst = arith.constant dense<0.000000e+00> : vector<1x64xf32>
    %4 = tpu.matmul %1, %3, %cst {dimension_numbers = #tpu.dot_dimension_numbers<[1], [0], [0], [1], [0, 0, 1, 1], [], []>} : vector<1x32xf32>, vector<32x64xf32>, vector<1x64xf32> -> vector<1x64xf32>
    %c0_5 = arith.constant 0 : index
    %c0_6 = arith.constant 0 : index
    %5 = vector.load %arg7[%c0_5, %c0_6] : memref<8x64xf32, #tpu.memory_space<vmem>>, vector<1x64xf32>
    tpu.vector_store %arg7[%c0_5, %c0_6], %4 {strides = array<i32>} : memref<8x64xf32, #tpu.memory_space<vmem>>, vector<1x64xf32>,
    %c1 = arith.constant 1 : index
    %c0_7 = arith.constant 0 : index
    %c0_8 = arith.constant 0 : index
    %6 = vector.load %arg2[%c1, %c0_7, %c0_8] : memref<8x32x64xf32, #tpu.memory_space<vmem>>, vector<1x32x64xf32>
    %7 = vector.shape_cast %6 : vector<1x32x64xf32> to vector<32x64xf32>
    %cst_9 = arith.constant dense<0.000000e+00> : vector<1x64xf32>
    %8 = tpu.matmul %1, %7, %cst_9 {dimension_numbers = #tpu.dot_dimension_numbers<[1], [0], [0], [1], [0, 0, 1, 1], [], []>} : vector<1x32xf32>, vector<32x64xf32>, vector<1x64xf32> -> vector<1x64xf32>
    %c1_10 = arith.constant 1 : index
    %c0_11 = arith.constant 0 : index
    %9 = vector.load %arg7[%c1_10, %c0_11] : memref<8x64xf32, #tpu.memory_space<vmem>>, vector<1x64xf32>
    tpu.vector_store %arg7[%c1_10, %c0_11], %8 {strides = array<i32>} : memref<8x64xf32, #tpu.memory_space<vmem>>, vector<1x64xf32>,
    %c2 = arith.constant 2 : index
    %c0_12 = arith.constant 0 : index
    %c0_13 = arith.constant 0 : index
    %10 = vector.load %arg2[%c2, %c0_12, %c0_13] : memref<8x32x64xf32, #tpu.memory_space<vmem>>, vector<1x32x64xf32>
    %11 = vector.shape_cast %10 : vector<1x32x64xf32> to vector<32x64xf32>
    %cst_14 = arith.constant dense<0.000000e+00> : vector<1x64xf32>
    %12 = tpu.matmul %1, %11, %cst_14 {dimension_numbers = #tpu.dot_dimension_numbers<[1], [0], [0], [1], [0, 0, 1, 1], [], []>} : vector<1x32xf32>, vector<32x64xf32>, vector<1x64xf32> -> vector<1x64xf32>
    %c2_15 = arith.constant 2 : index
    %c0_16 = arith.constant 0 : index
    %13 = vector.load %arg7[%c2_15, %c0_16] : memref<8x64xf32, #tpu.memory_space<vmem>>, vector<1x64xf32>
    tpu.vector_store %arg7[%c2_15, %c0_16], %12 {strides = array<i32>} : memref<8x64xf32, #tpu.memory_space<vmem>>, vector<1x64xf32>,
    %c3 = arith.constant 3 : index
    %c0_17 = arith.constant 0 : index
    %c0_18 = arith.constant 0 : index
    %14 = vector.load %arg2[%c3, %c0_17, %c0_18] : memref<8x32x64xf32, #tpu.memory_space<vmem>>, vector<1x32x64xf32>
    %15 = vector.shape_cast %14 : vector<1x32x64xf32> to vector<32x64xf32>
    %cst_19 = arith.constant dense<0.000000e+00> : vector<1x64xf32>
    %16 = tpu.matmul %1, %15, %cst_19 {dimension_numbers = #tpu.dot_dimension_numbers<[1], [0], [0], [1], [0, 0, 1, 1], [], []>} : vector<1x32xf32>, vector<32x64xf32>, vector<1x64xf32> -> vector<1x64xf32>
    %c3_20 = arith.constant 3 : index
    %c0_21 = arith.constant 0 : index
    %17 = vector.load %arg7[%c3_20, %c0_21] : memref<8x64xf32, #tpu.memory_space<vmem>>, vector<1x64xf32>
    tpu.vector_store %arg7[%c3_20, %c0_21], %16 {strides = array<i32>} : memref<8x64xf32, #tpu.memory_space<vmem>>, vector<1x64xf32>,
    %c4 = arith.constant 4 : index
    %c0_22 = arith.constant 0 : index
    %c0_23 = arith.constant 0 : index
    %18 = vector.load %arg2[%c4, %c0_22, %c0_23] : memref<8x32x64xf32, #tpu.memory_space<vmem>>, vector<1x32x64xf32>
    %19 = vector.shape_cast %18 : vector<1x32x64xf32> to vector<32x64xf32>
    %cst_24 = arith.constant dense<0.000000e+00> : vector<1x64xf32>
    %20 = tpu.matmul %1, %19, %cst_24 {dimension_numbers = #tpu.dot_dimension_numbers<[1], [0], [0], [1], [0, 0, 1, 1], [], []>} : vector<1x32xf32>, vector<32x64xf32>, vector<1x64xf32> -> vector<1x64xf32>
    %c4_25 = arith.constant 4 : index
    %c0_26 = arith.constant 0 : index
    %21 = vector.load %arg7[%c4_25, %c0_26] : memref<8x64xf32, #tpu.memory_space<vmem>>, vector<1x64xf32>
    tpu.vector_store %arg7[%c4_25, %c0_26], %20 {strides = array<i32>} : memref<8x64xf32, #tpu.memory_space<vmem>>, vector<1x64xf32>,
    %c5 = arith.constant 5 : index
    %c0_27 = arith.constant 0 : index
    %c0_28 = arith.constant 0 : index
    %22 = vector.load %arg2[%c5, %c0_27, %c0_28] : memref<8x32x64xf32, #tpu.memory_space<vmem>>, vector<1x32x64xf32>
    %23 = vector.shape_cast %22 : vector<1x32x64xf32> to vector<32x64xf32>
    %cst_29 = arith.constant dense<0.000000e+00> : vector<1x64xf32>
    %24 = tpu.matmul %1, %23, %cst_29 {dimension_numbers = #tpu.dot_dimension_numbers<[1], [0], [0], [1], [0, 0, 1, 1], [], []>} : vector<1x32xf32>, vector<32x64xf32>, vector<1x64xf32> -> vector<1x64xf32>
    %c5_30 = arith.constant 5 : index
    %c0_31 = arith.constant 0 : index
    %25 = vector.load %arg7[%c5_30, %c0_31] : memref<8x64xf32, #tpu.memory_space<vmem>>, vector<1x64xf32>
    tpu.vector_store %arg7[%c5_30, %c0_31], %24 {strides = array<i32>} : memref<8x64xf32, #tpu.memory_space<vmem>>, vector<1x64xf32>,
    %c6 = arith.constant 6 : index
    %c0_32 = arith.constant 0 : index
    %c0_33 = arith.constant 0 : index
    %26 = vector.load %arg2[%c6, %c0_32, %c0_33] : memref<8x32x64xf32, #tpu.memory_space<vmem>>, vector<1x32x64xf32>
    %27 = vector.shape_cast %26 : vector<1x32x64xf32> to vector<32x64xf32>
    %cst_34 = arith.constant dense<0.000000e+00> : vector<1x64xf32>
    %28 = tpu.matmul %1, %27, %cst_34 {dimension_numbers = #tpu.dot_dimension_numbers<[1], [0], [0], [1], [0, 0, 1, 1], [], []>} : vector<1x32xf32>, vector<32x64xf32>, vector<1x64xf32> -> vector<1x64xf32>
    %c6_35 = arith.constant 6 : index
    %c0_36 = arith.constant 0 : index
    %29 = vector.load %arg7[%c6_35, %c0_36] : memref<8x64xf32, #tpu.memory_space<vmem>>, vector<1x64xf32>
    tpu.vector_store %arg7[%c6_35, %c0_36], %28 {strides = array<i32>} : memref<8x64xf32, #tpu.memory_space<vmem>>, vector<1x64xf32>,
    %c7 = arith.constant 7 : index
    %c0_37 = arith.constant 0 : index
    %c0_38 = arith.constant 0 : index
    %30 = vector.load %arg2[%c7, %c0_37, %c0_38] : memref<8x32x64xf32, #tpu.memory_space<vmem>>, vector<1x32x64xf32>
    %31 = vector.shape_cast %30 : vector<1x32x64xf32> to vector<32x64xf32>
    %cst_39 = arith.constant dense<0.000000e+00> : vector<1x64xf32>
    %32 = tpu.matmul %1, %31, %cst_39 {dimension_numbers = #tpu.dot_dimension_numbers<[1], [0], [0], [1], [0, 0, 1, 1], [], []>} : vector<1x32xf32>, vector<32x64xf32>, vector<1x64xf32> -> vector<1x64xf32>
    %c7_40 = arith.constant 7 : index
    %c0_41 = arith.constant 0 : index
    %33 = vector.load %arg7[%c7_40, %c0_41] : memref<8x64xf32, #tpu.memory_space<vmem>>, vector<1x64xf32>
    tpu.vector_store %arg7[%c7_40, %c0_41], %32 {strides = array<i32>} : memref<8x64xf32, #tpu.memory_space<vmem>>, vector<1x64xf32>,
    %c0_42 = arith.constant 0 : index
    %c0_43 = arith.constant 0 : index
    %34 = vector.load %arg7[%c0_42, %c0_43] : memref<8x64xf32, #tpu.memory_space<vmem>>, vector<8x64xf32>
    %c0_44 = arith.constant 0 : index
    %c0_45 = arith.constant 0 : index
    %35 = vector.load %arg3[%c0_44, %c0_45] : memref<8x64xf32, #tpu.memory_space<vmem>>, vector<8x64xf32>
    %36 = arith.addf %34, %35 : vector<8x64xf32>
    %cst_46 = arith.constant dense<0.000000e+00> : vector<8xf32>
    %37 = vector.multi_reduction <add>, %36, %cst_46 [1] : vector<8x64xf32> to vector<8xf32>
    %38 = vector.shape_cast %37 : vector<8xf32> to vector<8x1xf32>
    %cst_47 = arith.constant 6.400000e+01 : f32
    %39 = vector.broadcast %cst_47 : f32 to vector<8x1xf32>
    %40 = arith.divf %38, %39 : vector<8x1xf32>
    %41 = vector.broadcast %40 : vector<8x1xf32> to vector<8x64xf32>
    %42 = arith.subf %36, %41 : vector<8x64xf32>
    %43 = vector.broadcast %40 : vector<8x1xf32> to vector<8x64xf32>
    %44 = arith.subf %36, %43 : vector<8x64xf32>
    %45 = arith.mulf %42, %44 : vector<8x64xf32>
    %cst_48 = arith.constant dense<0.000000e+00> : vector<8xf32>
    %46 = vector.multi_reduction <add>, %45, %cst_48 [1] : vector<8x64xf32> to vector<8xf32>
    %47 = vector.shape_cast %46 : vector<8xf32> to vector<8x1xf32>
    %cst_49 = arith.constant 6.400000e+01 : f32
    %48 = vector.broadcast %cst_49 : f32 to vector<8x1xf32>
    %49 = arith.divf %47, %48 : vector<8x1xf32>
    %50 = vector.broadcast %40 : vector<8x1xf32> to vector<8x64xf32>
    %51 = arith.subf %36, %50 : vector<8x64xf32>
    %cst_50 = arith.constant 9.99999974E-6 : f32
    %52 = vector.broadcast %cst_50 : f32 to vector<8x1xf32>
    %53 = arith.addf %49, %52 : vector<8x1xf32>
    %54 = math.rsqrt %53 : vector<8x1xf32>
    %55 = vector.broadcast %54 : vector<8x1xf32> to vector<8x64xf32>
    %56 = arith.mulf %51, %55 : vector<8x64xf32>
    %cst_51 = arith.constant 0.000000e+00 : f32
    %57 = vector.broadcast %cst_51 : f32 to vector<8x64xf32>
    %58 = arith.cmpf ogt, %56, %57 : vector<8x64xf32>
    %cst_52 = arith.constant 2.000000e-01 : f32
    %59 = vector.broadcast %cst_52 : f32 to vector<8x64xf32>
    %60 = arith.mulf %59, %56 : vector<8x64xf32>
    %61 = arith.select %58, %56, %60 : vector<8x64xi1>, vector<8x64xf32>
    %c0_53 = arith.constant 0 : index
    %c0_54 = arith.constant 0 : index
    %62 = vector.load %arg4[%c0_53, %c0_54] : memref<8x72xf32, #tpu.memory_space<vmem>>, vector<8x72xf32>
    %c0_55 = arith.constant 0 : index
    %c0_56 = arith.constant 0 : index
    %63 = vector.load %arg5[%c0_55, %c0_56] : memref<8x1xf32, #tpu.memory_space<vmem>>, vector<8x1xf32>
    %64 = tpu.iota {dimensions = array<i32: 1>} : vector<1x64xi32>
    %c3_i32 = arith.constant 3 : i32
    %65 = vector.broadcast %c3_i32 : i32 to vector<1x64xi32>
    %66 = arith.shrsi %64, %65 : vector<1x64xi32>
    %c7_i32 = arith.constant 7 : i32
    %67 = vector.broadcast %c7_i32 : i32 to vector<1x64xi32>
    %68 = arith.andi %64, %67 : vector<1x64xi32>
    %69 = vector.extract_strided_slice %61 {offsets = [0, 55], sizes = [8, 9], strides = [1, 1]} : vector<8x64xf32> to vector<8x9xf32>
    %70 = vector.extract_strided_slice %61 {offsets = [0, 0], sizes = [8, 55], strides = [1, 1]} : vector<8x64xf32> to vector<8x55xf32>
    %71 = tpu.concatenate %69, %70 in 1 : vector<8x9xf32>, vector<8x55xf32> -> vector<8x64xf32>
    %c1_i32 = arith.constant 1 : i32
    %72 = vector.broadcast %c1_i32 : i32 to vector<1x64xi32>
    %73 = arith.cmpi sge, %66, %72 : vector<1x64xi32>
    %c1_i32_57 = arith.constant 1 : i32
    %74 = vector.broadcast %c1_i32_57 : i32 to vector<1x64xi32>
    %75 = arith.cmpi sge, %68, %74 : vector<1x64xi32>
    %76 = arith.andi %73, %75 : vector<1x64xi1>
    %cst_58 = arith.constant 0.000000e+00 : f32
    %77 = vector.shape_cast %76 : vector<1x64xi1> to vector<1x64xi1>
    %78 = vector.broadcast %77 : vector<1x64xi1> to vector<8x64xi1>
    %79 = vector.broadcast %cst_58 : f32 to vector<8x64xf32>
    %80 = arith.select %78, %71, %79 : vector<8x64xi1>, vector<8x64xf32>
    %81 = vector.extract_strided_slice %61 {offsets = [0, 56], sizes = [8, 8], strides = [1, 1]} : vector<8x64xf32> to vector<8x8xf32>
    %82 = vector.extract_strided_slice %61 {offsets = [0, 0], sizes = [8, 56], strides = [1, 1]} : vector<8x64xf32> to vector<8x56xf32>
    %83 = tpu.concatenate %81, %82 in 1 : vector<8x8xf32>, vector<8x56xf32> -> vector<8x64xf32>
    %c1_i32_59 = arith.constant 1 : i32
    %84 = vector.broadcast %c1_i32_59 : i32 to vector<1x64xi32>
    %85 = arith.cmpi sge, %66, %84 : vector<1x64xi32>
    %cst_60 = arith.constant 0.000000e+00 : f32
    %86 = vector.shape_cast %85 : vector<1x64xi1> to vector<1x64xi1>
    %87 = vector.broadcast %86 : vector<1x64xi1> to vector<8x64xi1>
    %88 = vector.broadcast %cst_60 : f32 to vector<8x64xf32>
    %89 = arith.select %87, %83, %88 : vector<8x64xi1>, vector<8x64xf32>
    %90 = vector.extract_strided_slice %61 {offsets = [0, 57], sizes = [8, 7], strides = [1, 1]} : vector<8x64xf32> to vector<8x7xf32>
    %91 = vector.extract_strided_slice %61 {offsets = [0, 0], sizes = [8, 57], strides = [1, 1]} : vector<8x64xf32> to vector<8x57xf32>
    %92 = tpu.concatenate %90, %91 in 1 : vector<8x7xf32>, vector<8x57xf32> -> vector<8x64xf32>
    %c1_i32_61 = arith.constant 1 : i32
    %93 = vector.broadcast %c1_i32_61 : i32 to vector<1x64xi32>
    %94 = arith.cmpi sge, %66, %93 : vector<1x64xi32>
    %c6_i32 = arith.constant 6 : i32
    %95 = vector.broadcast %c6_i32 : i32 to vector<1x64xi32>
    %96 = arith.cmpi sle, %68, %95 : vector<1x64xi32>
    %97 = arith.andi %94, %96 : vector<1x64xi1>
    %cst_62 = arith.constant 0.000000e+00 : f32
    %98 = vector.shape_cast %97 : vector<1x64xi1> to vector<1x64xi1>
    %99 = vector.broadcast %98 : vector<1x64xi1> to vector<8x64xi1>
    %100 = vector.broadcast %cst_62 : f32 to vector<8x64xf32>
    %101 = arith.select %99, %92, %100 : vector<8x64xi1>, vector<8x64xf32>
    %102 = vector.extract_strided_slice %61 {offsets = [0, 63], sizes = [8, 1], strides = [1, 1]} : vector<8x64xf32> to vector<8x1xf32>
    %103 = vector.extract_strided_slice %61 {offsets = [0, 0], sizes = [8, 63], strides = [1, 1]} : vector<8x64xf32> to vector<8x63xf32>
    %104 = tpu.concatenate %102, %103 in 1 : vector<8x1xf32>, vector<8x63xf32> -> vector<8x64xf32>
    %c1_i32_63 = arith.constant 1 : i32
    %105 = vector.broadcast %c1_i32_63 : i32 to vector<1x64xi32>
    %106 = arith.cmpi sge, %68, %105 : vector<1x64xi32>
    %cst_64 = arith.constant 0.000000e+00 : f32
    %107 = vector.shape_cast %106 : vector<1x64xi1> to vector<1x64xi1>
    %108 = vector.broadcast %107 : vector<1x64xi1> to vector<8x64xi1>
    %109 = vector.broadcast %cst_64 : f32 to vector<8x64xf32>
    %110 = arith.select %108, %104, %109 : vector<8x64xi1>, vector<8x64xf32>
    %111 = vector.extract_strided_slice %61 {offsets = [0, 1], sizes = [8, 63], strides = [1, 1]} : vector<8x64xf32> to vector<8x63xf32>
    %112 = vector.extract_strided_slice %61 {offsets = [0, 0], sizes = [8, 1], strides = [1, 1]} : vector<8x64xf32> to vector<8x1xf32>
    %113 = tpu.concatenate %111, %112 in 1 : vector<8x63xf32>, vector<8x1xf32> -> vector<8x64xf32>
    %c6_i32_65 = arith.constant 6 : i32
    %114 = vector.broadcast %c6_i32_65 : i32 to vector<1x64xi32>
    %115 = arith.cmpi sle, %68, %114 : vector<1x64xi32>
    %cst_66 = arith.constant 0.000000e+00 : f32
    %116 = vector.shape_cast %115 : vector<1x64xi1> to vector<1x64xi1>
    %117 = vector.broadcast %116 : vector<1x64xi1> to vector<8x64xi1>
    %118 = vector.broadcast %cst_66 : f32 to vector<8x64xf32>
    %119 = arith.select %117, %113, %118 : vector<8x64xi1>, vector<8x64xf32>
    %120 = vector.extract_strided_slice %61 {offsets = [0, 7], sizes = [8, 57], strides = [1, 1]} : vector<8x64xf32> to vector<8x57xf32>
    %121 = vector.extract_strided_slice %61 {offsets = [0, 0], sizes = [8, 7], strides = [1, 1]} : vector<8x64xf32> to vector<8x7xf32>
    %122 = tpu.concatenate %120, %121 in 1 : vector<8x57xf32>, vector<8x7xf32> -> vector<8x64xf32>
    %c6_i32_67 = arith.constant 6 : i32
    %123 = vector.broadcast %c6_i32_67 : i32 to vector<1x64xi32>
    %124 = arith.cmpi sle, %66, %123 : vector<1x64xi32>
    %c1_i32_68 = arith.constant 1 : i32
    %125 = vector.broadcast %c1_i32_68 : i32 to vector<1x64xi32>
    %126 = arith.cmpi sge, %68, %125 : vector<1x64xi32>
    %127 = arith.andi %124, %126 : vector<1x64xi1>
    %cst_69 = arith.constant 0.000000e+00 : f32
    %128 = vector.shape_cast %127 : vector<1x64xi1> to vector<1x64xi1>
    %129 = vector.broadcast %128 : vector<1x64xi1> to vector<8x64xi1>
    %130 = vector.broadcast %cst_69 : f32 to vector<8x64xf32>
    %131 = arith.select %129, %122, %130 : vector<8x64xi1>, vector<8x64xf32>
    %132 = vector.extract_strided_slice %61 {offsets = [0, 8], sizes = [8, 56], strides = [1, 1]} : vector<8x64xf32> to vector<8x56xf32>
    %133 = vector.extract_strided_slice %61 {offsets = [0, 0], sizes = [8, 8], strides = [1, 1]} : vector<8x64xf32> to vector<8x8xf32>
    %134 = tpu.concatenate %132, %133 in 1 : vector<8x56xf32>, vector<8x8xf32> -> vector<8x64xf32>
    %c6_i32_70 = arith.constant 6 : i32
    %135 = vector.broadcast %c6_i32_70 : i32 to vector<1x64xi32>
    %136 = arith.cmpi sle, %66, %135 : vector<1x64xi32>
    %cst_71 = arith.constant 0.000000e+00 : f32
    %137 = vector.shape_cast %136 : vector<1x64xi1> to vector<1x64xi1>
    %138 = vector.broadcast %137 : vector<1x64xi1> to vector<8x64xi1>
    %139 = vector.broadcast %cst_71 : f32 to vector<8x64xf32>
    %140 = arith.select %138, %134, %139 : vector<8x64xi1>, vector<8x64xf32>
    %141 = vector.extract_strided_slice %61 {offsets = [0, 9], sizes = [8, 55], strides = [1, 1]} : vector<8x64xf32> to vector<8x55xf32>
    %142 = vector.extract_strided_slice %61 {offsets = [0, 0], sizes = [8, 9], strides = [1, 1]} : vector<8x64xf32> to vector<8x9xf32>
    %143 = tpu.concatenate %141, %142 in 1 : vector<8x55xf32>, vector<8x9xf32> -> vector<8x64xf32>
    %c6_i32_72 = arith.constant 6 : i32
    %144 = vector.broadcast %c6_i32_72 : i32 to vector<1x64xi32>
    %145 = arith.cmpi sle, %66, %144 : vector<1x64xi32>
    %c6_i32_73 = arith.constant 6 : i32
    %146 = vector.broadcast %c6_i32_73 : i32 to vector<1x64xi32>
    %147 = arith.cmpi sle, %68, %146 : vector<1x64xi32>
    %148 = arith.andi %145, %147 : vector<1x64xi1>
    %cst_74 = arith.constant 0.000000e+00 : f32
    %149 = vector.shape_cast %148 : vector<1x64xi1> to vector<1x64xi1>
    %150 = vector.broadcast %149 : vector<1x64xi1> to vector<8x64xi1>
    %151 = vector.broadcast %cst_74 : f32 to vector<8x64xf32>
    %152 = arith.select %150, %143, %151 : vector<8x64xi1>, vector<8x64xf32>
    %153 = tpu.concatenate %80, %89, %101, %110, %61, %119, %131, %140, %152 in 0 : vector<8x64xf32>, vector<8x64xf32>, vector<8x64xf32>, vector<8x64xf32>, vector<8x64xf32>, vector<8x64xf32>, vector<8x64xf32>, vector<8x64xf32>, vector<8x64xf32> -> vector<72x64xf32>
    %cst_75 = arith.constant dense<0.000000e+00> : vector<8x64xf32>
    %154 = tpu.matmul %62, %153, %cst_75 {dimension_numbers = #tpu.dot_dimension_numbers<[1], [0], [0], [1], [0, 0, 1, 1], [], []>} : vector<8x72xf32>, vector<72x64xf32>, vector<8x64xf32> -> vector<8x64xf32>
    %155 = vector.broadcast %63 : vector<8x1xf32> to vector<8x64xf32>
    %156 = arith.addf %154, %155 : vector<8x64xf32>
    %cst_76 = arith.constant dense<0.000000e+00> : vector<8xf32>
    %157 = vector.multi_reduction <add>, %156, %cst_76 [1] : vector<8x64xf32> to vector<8xf32>
    %158 = vector.shape_cast %157 : vector<8xf32> to vector<8x1xf32>
    %cst_77 = arith.constant 6.400000e+01 : f32
    %159 = vector.broadcast %cst_77 : f32 to vector<8x1xf32>
    %160 = arith.divf %158, %159 : vector<8x1xf32>
    %161 = vector.broadcast %160 : vector<8x1xf32> to vector<8x64xf32>
    %162 = arith.subf %156, %161 : vector<8x64xf32>
    %163 = vector.broadcast %160 : vector<8x1xf32> to vector<8x64xf32>
    %164 = arith.subf %156, %163 : vector<8x64xf32>
    %165 = arith.mulf %162, %164 : vector<8x64xf32>
    %cst_78 = arith.constant dense<0.000000e+00> : vector<8xf32>
    %166 = vector.multi_reduction <add>, %165, %cst_78 [1] : vector<8x64xf32> to vector<8xf32>
    %167 = vector.shape_cast %166 : vector<8xf32> to vector<8x1xf32>
    %cst_79 = arith.constant 6.400000e+01 : f32
    %168 = vector.broadcast %cst_79 : f32 to vector<8x1xf32>
    %169 = arith.divf %167, %168 : vector<8x1xf32>
    %170 = vector.broadcast %160 : vector<8x1xf32> to vector<8x64xf32>
    %171 = arith.subf %156, %170 : vector<8x64xf32>
    %cst_80 = arith.constant 9.99999974E-6 : f32
    %172 = vector.broadcast %cst_80 : f32 to vector<8x1xf32>
    %173 = arith.addf %169, %172 : vector<8x1xf32>
    %174 = math.rsqrt %173 : vector<8x1xf32>
    %175 = vector.broadcast %174 : vector<8x1xf32> to vector<8x64xf32>
    %176 = arith.mulf %171, %175 : vector<8x64xf32>
    %cst_81 = arith.constant 0.000000e+00 : f32
    %177 = vector.broadcast %cst_81 : f32 to vector<8x64xf32>
    %178 = arith.cmpf ogt, %176, %177 : vector<8x64xf32>
    %cst_82 = arith.constant 2.000000e-01 : f32
    %179 = vector.broadcast %cst_82 : f32 to vector<8x64xf32>
    %180 = arith.mulf %179, %176 : vector<8x64xf32>
    %181 = arith.select %178, %176, %180 : vector<8x64xi1>, vector<8x64xf32>
    %c0_83 = arith.constant 0 : index
    %c0_84 = arith.constant 0 : index
    %c0_85 = arith.constant 0 : index
    %182 = vector.load %arg6[%c0_83, %c0_84, %c0_85] : memref<1x8x64xf32, #tpu.memory_space<vmem>>, vector<1x8x64xf32>
    %183 = vector.shape_cast %182 : vector<1x8x64xf32> to vector<8x64xf32>
    %184 = vector.shape_cast %181 : vector<8x64xf32> to vector<1x8x64xf32>
    tpu.vector_store %arg6[%c0_83, %c0_84, %c0_85], %184 {strides = array<i32>} : memref<1x8x64xf32, #tpu.memory_space<vmem>>, vector<1x8x64xf32>,
    return
  }
  func.func @transform_0(%arg0: i32) -> (i32, i32, i32) {
    %c0_i32 = arith.constant 0 : i32
    %c0_i32_0 = arith.constant 0 : i32
    %c0_i32_1 = arith.constant 0 : i32
    return %arg0, %c0_i32, %c0_i32_0 : i32, i32, i32
  }
  func.func @transform_1(%arg0: i32) -> (i32, i32, i32) {
    %c0_i32 = arith.constant 0 : i32
    %c0_i32_0 = arith.constant 0 : i32
    %c0_i32_1 = arith.constant 0 : i32
    %c0_i32_2 = arith.constant 0 : i32
    return %c0_i32, %c0_i32_0, %c0_i32_1 : i32, i32, i32
  }
  func.func @transform_2(%arg0: i32) -> (i32, i32) {
    %c0_i32 = arith.constant 0 : i32
    %c0_i32_0 = arith.constant 0 : i32
    %c0_i32_1 = arith.constant 0 : i32
    return %c0_i32, %c0_i32_0 : i32, i32
  }
  func.func @transform_3(%arg0: i32) -> (i32, i32) {
    %c0_i32 = arith.constant 0 : i32
    %c0_i32_0 = arith.constant 0 : i32
    %c0_i32_1 = arith.constant 0 : i32
    return %c0_i32, %c0_i32_0 : i32, i32
  }
  func.func @transform_4(%arg0: i32) -> (i32, i32) {
    %c0_i32 = arith.constant 0 : i32
    %c0_i32_0 = arith.constant 0 : i32
    %c0_i32_1 = arith.constant 0 : i32
    return %c0_i32, %c0_i32_0 : i32, i32
  }
  func.func @transform_5(%arg0: i32) -> (i32, i32, i32) {
    %c0_i32 = arith.constant 0 : i32
    %c0_i32_0 = arith.constant 0 : i32
    %c0_i32_1 = arith.constant 0 : i32
    return %arg0, %c0_i32, %c0_i32_0 : i32, i32, i32
  }
}

</mosaic_0001>

<bundles_post_ra>
// kernel: tpu_custom_call.1
= control target key start
LH: loop header
LB: loop body
LE: loop exit
PB: predicated region body
PF: predicated region fallthrough
CT: control target
= control target key end

     0   :  { %10 = vsyncpa [#allocation4], 0  ;;  %s2035_s0 = inlined_call_operand.hbm [shape: f32[2,1,32], index: 0, kind: input, shape index: {}]   ;;  %s2036_s1 = inlined_call_operand.hbm [shape: f32[8,32,64], index: 1, kind: input, shape index: {}]   ;;  %s2037_s2 = inlined_call_operand.vmem [shape: f32[8,64], index: 2, kind: input, shape index: {}]   ;;  %s2038_s3 = inlined_call_operand.vmem [shape: f32[8,72], index: 3, kind: input, shape index: {}]   ;;  %s2039_s4 = inlined_call_operand.vmem [shape: f32[8,1], index: 4, kind: input, shape index: {}]   ;;  %s2040_s5 = inlined_call_operand.hbm [shape: f32[2,8,64], index: 5, kind: output, shape index: {}]  }
   0x1   :  { %12 = vsyncpa [#allocation4 + $0x1], 0 }
   0x2   :  { %13 = vsyncpa [#allocation7], 0 }
   0x3   :  { %14 = vsyncpa [#allocation5], 0 }
   0x4   :  { %16 = vsyncpa [#allocation5 + $0x1], 0  ;;  %s1700_s18 = smov 0   ;;  %s1702_s19 = smov 0  }
   0x5   :  { %s1704_s20 = smov 0   ;;  %s1706_s21 = smov 0  }
   0x6 LB: > { %s1721_s22 = sadd.s32 4294967295, %s1642_s21   ;;  %s1176_s23 = sadd.s32 4294967294, %s1642_s21   ;;  %s1642_s21 = sphi %s1706_s21, %s2068_s21   ;;  %s1638_s20 = sphi %s1704_s20, %s2067_s20   ;;  %s1634_s19 = sphi %s1702_s19, %s2066_s19   ;;  %s1630_s18 = sphi %s1700_s18, %s2065_s18  }
   0x7   : > { %p42_p0 = scmp.ne.s32.totalorder %s1634_s19, %s1630_s18  ;;  %p2041_p1 = scmp.eq.s32.totalorder %s1721_s22, 0 }
   0x8   : > { %p156_p3 = scmp.eq.s32.totalorder %s1176_s23, 1  ;;  %p1177_p5 = scmp.ge.s32.totalorder %s1642_s21, 1 }
   0x9   : > { %p1730_p4 = por %p2041_p1, %p42_p0  ;;  %p163_p7 = scmp.lt.s32.totalorder %s1642_s21, 3 }
   0xa   : > { %p1735_p6 = por %p156_p3, %p42_p0  ;;  %s1644_s27 = smov [#allocation6]  }
   0xb   : > { %s2044_s24 = scalar_select %p1730_p4, 1, 0 }
   0xc   : > { %s2045_s25 = scalar_select %p1735_p6, 1, 0 }
   0xd   : > { %p1740_p8 = pnand %p1177_p5, %p163_p7  ;;  %s175_s28 = sshll.u32 %s1644_s27, 4  ;;  %s1744_s28 = int_to_ptr.vmem [resolvable:$true] %s175_s28 }
   0xe   : > { %s1756_s30 = sadd.s32 1, %s1642_s21   ;;  %s29_s6 = sadd.s32 1, %s1638_s20 }
   0xf   : > { %s2046_s26 = scalar_select %p1740_p8, 1, 0 }
  0x10   : > { %p1436_p9 = pneg %p1740_p8  ;;  %s26_s7 = ssub.s32 %s1642_s21, %s1756_s30 }
  0x11   : > { %s1514_s10 = scalar_lea.hbm %s2036_s1, 4096 }
  0x12   : > { %p1751_p11 = pnand %p1436_p9, %p2041_p1  ;;  %p1515_p12 = scmp.ne.s32.totalorder %s2036_s1, %s1514_s10 }
  0x13   : > { %p1521_p5 = scmp.lt.u32.totalorder %s1514_s10, %s2036_s1 }
  0x14   : > { %p1516_p13 = pneg %p1751_p11 }
  0x16   : > { %p1517_p0 = pnand %p1516_p13, %p1515_p12 }
  0x18   : > { %p1518_p3 = pneg %p1517_p0 }
  0x1a   : > { %p1523_p7 = pnand %p1521_p5, %p1518_p3 }
  0x1c   : > { %1526 = shalt.err (!%p1523_p7)
}
  0x1d   : > { %s1527_s15 = scalar_lea.vmem %s1744_s28, 4096  ;;  %p1535_p2 = scmp.lt.s32.totalorder %s1744_s28, %s1744_s28 }
  0x1e   : > { %p1528_p9 = scmp.ne.s32.totalorder %s1744_s28, %s1527_s15  ;;  %p1536_p6 = scmp.lt.s32.totalorder %s1527_s15, %s1527_s15 }
  0x20   : > { %p1530_p10 = pnand %p1528_p9, %p1516_p13  ;;  %p1537_p4 = por %p1536_p6, %p1535_p2 }
  0x22   : > { %p1531_p1 = pneg %p1530_p10 }
  0x24   : > { %p1538_p8 = pnand %p1537_p4, %p1531_p1 }
  0x26   : > { %1541 = shalt.err (!%p1538_p8)
}
  0x27   : > { %s1645_s16 = smov 128   ;;  %s1646_s17 = smov 8  }
  0x28   : > { %1439 = dma.hbm_to_vmem [thread:$0]  (!%p1751_p11), %s2036_s1, 4096, %s1744_s28, [#allocation7], %s1645_s16, %s1645_s16, %s1646_s17  }
  0x29   : > { %p27_p2 = scmp.eq.s32.totalorder %s26_s7, 0  ;;  %p36_p1 = scmp.ne.s32.totalorder %s1638_s20, %s1634_s19 }
  0x2a   : > { %p37_p4 = scmp.eq.s32.totalorder %s1642_s21, 0  ;;  %p1449_p6 = scmp.lt.s32.totalorder %s1642_s21, 2 }
  0x2b   : > { %s1787_s8 = scalar_select %p27_p2, %s1638_s20, %s29_s6  }
  0x2c   : > { %p38_p8 = por %p37_p4, %p36_p1  ;;  %p2048_p10 = scmp.eq.s32.totalorder %s1721_s22, 1 }
  0x2d   : > { %s198_s10 = sand.u32 1, %s1638_s20   ;;  %s1180_s11 = sshll.u32 %s1642_s21, 4 }
  0x2e   : > { %p1791_p12 = por %p2048_p10, %p36_p1  ;;  %s1800_s13 = scalar_lea.hbm %s2035_s0, %s1180_s11 }
  0x2f   : > { %s201_s28 = scalar_lea.vmem [#allocation3], %s198_s10  ;;  %p1804_p11 = pnand %p1449_p6, %p38_p8 }
  0x30   : > { %s208_s6 = sshll.u32 %s201_s28, 4  ;;  %s199_s14 = scalar_lea.sflag [#allocation4], %s198_s10  ;;  %s1802_s6 = int_to_ptr.vmem [resolvable:$true] %s208_s6 }
  0x31   : > { %s1542_s15 = scalar_lea.hbm %s1800_s13, 16  ;;  %p1544_p0 = pneg %p1804_p11 }
  0x32   : > { %p1543_p13 = scmp.ne.s32.totalorder %s1800_s13, %s1542_s15  ;;  %s1547_s23 = scalar_lea.hbm %s2035_s0, 32 }
  0x33   : > { %p1548_p7 = scmp.lt.u32.totalorder %s1800_s13, %s2035_s0  ;;  %p1549_p9 = scmp.lt.u32.totalorder %s1547_s23, %s1542_s15 }
  0x34   : > { %p1545_p3 = pnand %p1544_p0, %p1543_p13  ;;  %p1551_p1 = scmp.lt.u32.totalorder %s1542_s15, %s1800_s13 }
  0x35   : > { %p1550_p2 = por %p1549_p9, %p1548_p7 }
  0x36   : > { %p1546_p5 = pneg %p1545_p3 }
  0x37   : > { %p1552_p4 = por %p1551_p1, %p1550_p2 }
  0x39   : > { %p1553_p6 = pnand %p1552_p4, %p1546_p5 }
  0x3b   : > { %1556 = shalt.err (!%p1553_p6)
}
  0x3c   : > { %s1557_s10 = scalar_lea.vmem %s1802_s6, 16  ;;  %s1647_s12 = smov [#allocation3]  }
  0x3d   : > { %p1558_p8 = scmp.ne.s32.totalorder %s1802_s6, %s1557_s10  ;;  %s1562_s29 = sshll.u32 %s1647_s12, 4  ;;  %s1563_s29 = int_to_ptr.vmem [resolvable:$false] %s1562_s29 }
  0x3e   : > { %s1564_s28 = scalar_lea.vmem %s1563_s29, 32  ;;  %p1565_p3 = scmp.lt.s32.totalorder %s1802_s6, %s1563_s29 }
  0x3f   : > { %p1560_p10 = pnand %p1558_p8, %p1544_p0  ;;  %p1566_p7 = scmp.lt.s32.totalorder %s1564_s28, %s1557_s10 }
  0x41   : > { %p1561_p13 = pneg %p1560_p10  ;;  %p1567_p9 = por %p1566_p7, %p1565_p3 }
  0x43   : > { %p1568_p2 = pnand %p1567_p9, %p1561_p13 }
  0x45   : > { %1571 = shalt.err (!%p1568_p2)
}
  0x46   : > { %1443 = dma.hbm_to_vmem [thread:$0]  (!%p1804_p11), %s1800_s13, 16, %s1802_s6, %s199_s14  }
  0x47   : > { %p2051_p5 = scmp.ne.s32.totalorder %s2046_s26, 0 }
  0x48   : > { %s1836_s15 = sand.u32 (!%p2051_p5), 1, %s1634_s19   ;;  %p2052_p0 = scmp.ne.s32.totalorder (!%p2051_p5), %s2044_s24, 0 }
  0x49   : > { %217 = sbr.rel (%p2051_p5) target bundleno = 1359 (0x54f), region = 40  ;;  %s220_s16 = scalar_lea.sflag (!%p2051_p5), [#allocation4], %s1836_s15 }
  0x4a   : > { %s222_s17 = scalar_lea.vmem (!%p2051_p5), [#allocation3], %s1836_s15 }
  0x50   : > { %1617 = dma.done.wait (%p2052_p0), %s220_s16, 16  }
  0x51   : > { %1619 = vsyncadd (%p2052_p0), %s220_s16, 4294967280  ;;  %p2053_p1 = scmp.eq.s32.totalorder %s1721_s22, 0 }
  0x53   : > { %1621 = dma.done.wait (%p2053_p1), [#allocation7], 4096   ;;  %p2054_p11 = pmov %p2053_p1 }
  0x54   : > { %v1648_v0 = vmov 0.0|0.0   ;;  %vm1649_vm0 = vmmov 0   ;;  %v1650_v1 = vmov 0.0   ;;  %v253_v2 = vld [vmem:[#allocation6] sm:$0xff]  ;;  %v254_v3 = vld [vmem:[#allocation6 + $0x8] sm:$0xff]  ;;  %v255_v4 = vld [vmem:[#allocation6 + $0x10] sm:$0xff] }
  0x55   : > { %1623 = vsyncadd (%p2054_p11), [#allocation7], 4294963200  ;;  %1364 = vmatprep.subr.bf16.mxu1 %v1648_v0  ;;  %1263 = vmatprep.mubr.msk.f32.mxu1 %vm1649_vm0, %v1650_v1  ;;  %v1365_v5 = vpack.c.bf16 %v254_v3, %v253_v2  ;;  %v256_v6 = vld [vmem:[#allocation6 + $0x18] sm:$0xff]  ;;  %v334_v8 = vld [vmem:[#allocation6 + $0x20] sm:$0xff]  ;;  %vm257_vm1 = vcmask 261120   ;;  %vm331_vm2 = vcmask 516096  }
  0x56   : > { %1376 = vmatprep.subr.bf16.mxu0 %v1648_v0  ;;  %1285 = vmatprep.mubr.msk.f32.mxu0 %vm1649_vm0, %v1650_v1  ;;  %v1368_v7 = vpack.c.bf16 %v256_v6, %v255_v4  ;;  %v410_v9 = vld [vmem:[#allocation6 + $0x40] sm:$0xff]  ;;  %v411_v10 = vld [vmem:[#allocation6 + $0x48] sm:$0xff]  ;;  %v412_v13 = vld [vmem:[#allocation6 + $0x50] sm:$0xff]  ;;  %vm868_vm3 = vcmask 523264   ;;  %s1651_s13 = smov 72   ;;  %s1652_s6 = smov 73  }
  0x57   : > { %1366 = vmatpush3.bf16.msra.mxu1 %v1365_v5  ;;  %v335_v11 = vld [vmem:[#allocation6 + $0x28] sm:$0xff]  ;;  %v1377_v12 = vpack.c.bf16 %v411_v10, %v410_v9  ;;  %v413_v14 = vld [vmem:[#allocation6 + $0x58] sm:$0xff]  ;;  %v1855_v16 = vld [vmem:[%s222_s17] sm:$0x1]  ;;  %s1653_s7 = smov 63   ;;  %s1654_s14 = smov 9  }
  0x58   : > { %1367 = vmatprep.subr.bf16.mxu1 %v1648_v0  ;;  %v1380_v15 = vpack.c.bf16 %v413_v14, %v412_v13  ;;  %v1371_v17 = vpack.c.bf16 %v335_v11, %v334_v8  ;;  %v562_v18 = vld [vmem:[#allocation6 + $0x80] sm:$0xff]  ;;  %v563_v19 = vld [vmem:[#allocation6 + $0x88] sm:$0xff]  ;;  %v336_v20 = vld [vmem:[#allocation6 + $0x30] sm:$0xff]  ;;  %s1655_s23 = smov 57   ;;  %s1656_s27 = smov 8   ;;  %vm899_vm7 = vcmask 72704  }
  0x59   : > { %1378 = vmatpush3.bf16.msra.mxu0 %v1377_v12  ;;  %v337_v21 = vld [vmem:[#allocation6 + $0x38] sm:$0xff]  ;;  %v1389_v22 = vpack.c.bf16 %v563_v19, %v562_v18  ;;  %v564_v24 = vld [vmem:[#allocation6 + $0x90] sm:$0xff]  ;;  %v486_v26 = vld [vmem:[#allocation6 + $0x60] sm:$0xff]  ;;  %s1657_s11 = smov 56   ;;  %s1658_s10 = smov 71   ;;  %vm913_vm8 = vcmask 64512  }
  0x5a   : > { %1379 = vmatprep.subr.bf16.mxu0 %v1648_v0  ;;  %v1374_v23 = vpack.c.bf16 %v337_v21, %v336_v20  ;;  %v565_v25 = vld [vmem:[#allocation6 + $0x98] sm:$0xff]  ;;  %v487_v27 = vld [vmem:[#allocation6 + $0x68] sm:$0xff]  ;;  %v714_v30 = vld [vmem:[#allocation6 + $0xc0] sm:$0xff]  ;;  %s1659_s12 = smov 55   ;;  %s1660_s29 = smov 7   ;;  %v1665_v21 = vmov 0  }
  0x5b   : > { %1369 = vmatpush3.bf16.msra.mxu1 %v1368_v7  ;;  %v1392_v28 = vpack.c.bf16 %v565_v25, %v564_v24  ;;  %v1383_v29 = vpack.c.bf16 %v487_v27, %v486_v26  ;;  %v715_v31 = vld [vmem:[#allocation6 + $0xc8] sm:$0xff]  ;;  %v488_v32 = vld [vmem:[#allocation6 + $0x70] sm:$0xff]  ;;  %v489_v33 = vld [vmem:[#allocation6 + $0x78] sm:$0xff]  ;;  %s1661_s28 = smov 65   ;;  %s1662_s16 = smov 1   ;;  %1509 = vset.pattern.permute.xlu0 %v1665_v21  ;;  %vm924_vm12 = vcmask 56320  }
  0x5c   : > { %1370 = vmatprep.subr.bf16.mxu1 %v1648_v0  ;;  %v1401_v34 = vpack.c.bf16 %v715_v31, %v714_v30  ;;  %v1386_v35 = vpack.c.bf16 %v489_v33, %v488_v32  ;;  %v716_v36 = vld [vmem:[#allocation6 + $0xd0] sm:$0xff]  ;;  %v717_v37 = vld [vmem:[#allocation6 + $0xd8] sm:$0xff]  ;;  %v638_v38 = vld [vmem:[#allocation6 + $0xa0] sm:$0xff]  ;;  %s1663_s17 = smov 127   ;;  %s1664_s24 = smov 121   ;;  %1508 = vset.pattern.permute.xlu1 %v1665_v21  ;;  %vm937_vm13 = vcmask 7168  }
  0x5d   : > { %1381 = vmatpush3.bf16.msra.mxu0 %v1380_v15  ;;  %v639_v39 = vld [vmem:[#allocation6 + $0xa8] sm:$0xff]  ;;  %v1404_v40 = vpack.c.bf16 %v717_v37, %v716_v36  ;;  %v640_v42 = vld [vmem:[#allocation6 + $0xb0] sm:$0xff]  ;;  %v641_v43 = vld [vmem:[#allocation6 + $0xb8] sm:$0xff]  ;;  %s1666_s26 = smov 120  }
  0x5e   : > { %1264 = vmatmul.mubr.msk.f32.vlgmr.msra.gmra.mrb[0].mxu1 %vm257_vm1, %v1855_v16  ;;  %1388 = vmatprep.subr.bf16.mxu0 %v1648_v0  ;;  %v1395_v41 = vpack.c.bf16 %v639_v39, %v638_v38  ;;  %v1398_v44 = vpack.c.bf16 %v641_v43, %v640_v42  ;;  %v790_v45 = vld [vmem:[#allocation6 + $0xe0] sm:$0xff]  ;;  %v791_v46 = vld [vmem:[#allocation6 + $0xe8] sm:$0xff]  ;;  %v792_v48 = vld [vmem:[#allocation6 + $0xf0] sm:$0xff] }
  0x5f   : > { %1372 = vmatpush3.bf16.msra.mxu1 %v1371_v17  ;;  %1274 = vmatprep.mubr.msk.f32.mxu1 %vm1649_vm0, %v1650_v1  ;;  %v1407_v47 = vpack.c.bf16 %v791_v46, %v790_v45  ;;  %v793_v49 = vld [vmem:[#allocation6 + $0xf8] sm:$0xff] }
  0x60   : > { %1373 = vmatprep.subr.bf16.mxu1 %v1648_v0  ;;  %1286 = vmatmul.mubr.msk.f32.vlgmr.msra.gmra.mrb[0].mxu0 %vm257_vm1, %v1855_v16  ;;  %v1410_v50 = vpack.c.bf16 %v793_v49, %v792_v48  ;;  %v866_v5 = vld [vmem:[%s2037_s2] sm:$0xff] }
  0x61   : > { %1390 = vmatpush3.bf16.msra.mxu0 %v1389_v22  ;;  %1307 = vmatprep.mubr.msk.f32.mxu0 %vm1649_vm0, %v1650_v1  ;;  %v887_v22 = vld [vmem:[%s2039_s4] sm:$0xff] }
  0x62   : > { %1391 = vmatprep.subr.bf16.mxu0 %v1648_v0 }
  0x63   : > { %1375 = vmatpush3.bf16.msra.mxu1 %v1374_v23  ;;  %v888_v23 = vlaneseq }
  0x64   : > { %1382 = vmatprep.subr.bf16.mxu1 %v1648_v0 }
  0x65   : > { %1393 = vmatpush3.bf16.msra.mxu0 %v1392_v28  ;;  %v889_v24 = vand.u32 127, %v888_v23 }
  0x66   : > { %1275 = vmatmul.mubr.msk.f32.vlgmr.msra.gmra.mrb[2].mxu1 %vm257_vm1, %v1855_v16  ;;  %1400 = vmatprep.subr.bf16.mxu0 %v1648_v0 }
  0x67   : > { %1384 = vmatpush3.bf16.msra.mxu1 %v1383_v29  ;;  %1296 = vmatprep.mubr.msk.f32.mxu1 %vm1649_vm0, %v1650_v1  ;;  %v890_v25 = vshra.s32 %v889_v24, 3  ;;  %v891_v26 = vand.u32 7, %v889_v24 }
  0x68   : > { %1385 = vmatprep.subr.bf16.mxu1 %v1648_v0  ;;  %1308 = vmatmul.mubr.msk.f32.vlgmr.msra.gmra.mrb[2].mxu0 %vm257_vm1, %v1855_v16 }
  0x69   : > { %1402 = vmatpush3.bf16.msra.mxu0 %v1401_v34  ;;  %1329 = vmatprep.mubr.msk.f32.mxu0 %vm1649_vm0, %v1650_v1  ;;  %vm1935_vm5 = vcmp.ge.s32.totalorder %v890_v25, 1  ;;  %vm1939_vm6 = vcmp.ge.s32.totalorder %v891_v26, 1  ;;  %vm1950_vm11 = vcmp.le.s32.totalorder %v891_v26, 6 }
  0x6a   : > { %1403 = vmatprep.subr.bf16.mxu0 %v1648_v0  ;;  %vm903_vm9 = vmand %vm1935_vm5, %vm1939_vm6 }
  0x6b   : > { %1387 = vmatpush3.bf16.msra.mxu1 %v1386_v35  ;;  %vm1414_vm10 = vmpackc.low %vm1935_vm5, %vm903_vm9 }
  0x6c   : > { %1394 = vmatprep.subr.bf16.mxu1 %v1648_v0  ;;  %vm927_vm14 = vmand %vm1935_vm5, %vm1950_vm11  ;;  %vm959_vm5 = vcmask 465920  }
  0x6d   : > { %1405 = vmatpush3.bf16.msra.mxu0 %v1404_v40  ;;  %vm1418_vm15 = vmpackc.low %vm1939_vm6, %vm927_vm14 }
  0x6e   : > { %1297 = vmatmul.mubr.msk.f32.vlgmr.msra.gmra.mrb[4].mxu1 %vm257_vm1, %v1855_v16  ;;  %1412 = vmatprep.subr.bf16.mxu0 %v1648_v0 }
  0x6f   : > { %1396 = vmatpush3.bf16.msra.mxu1 %v1395_v41  ;;  %1318 = vmatprep.mubr.msk.f32.mxu1 %vm1649_vm0, %v1650_v1 }
  0x70   : > { %1397 = vmatprep.subr.bf16.mxu1 %v1648_v0  ;;  %1330 = vmatmul.mubr.msk.f32.vlgmr.msra.gmra.mrb[4].mxu0 %vm257_vm1, %v1855_v16 }
  0x71   : > { %1361 = vmatprep.mubr.msk.f32.mxu0 %vm1649_vm0, %v1650_v1 }
  0x73   : > { %1399 = vmatpush3.bf16.msra.mxu1 %v1398_v44 }
  0x74   : > { %1406 = vmatprep.subr.bf16.mxu1 %v1648_v0 }
  0x76   : > { %1319 = vmatmul.mubr.msk.f32.vlgmr.msra.gmra.mrb[6].mxu1 %vm257_vm1, %v1855_v16 }
  0x77   : > { %1408 = vmatpush3.bf16.msra.mxu1 %v1407_v47  ;;  %1340 = vmatprep.mubr.msk.f32.mxu1 %vm1649_vm0, %v1650_v1  ;;  %vm948_vm0 = vcmask 515072  }
  0x78   : > { %1409 = vmatprep.subr.bf16.mxu1 %v1648_v0 }
  0x7b   : > { %1411 = vmatpush3.bf16.msra.mxu1 %v1410_v50 }
  0x7e   : > { %1341 = vmatmul.mubr.msk.f32.vlgmr.msra.gmra.mrb[8].mxu1 %vm257_vm1, %v1855_v16  ;;  %vm1668_vm1 = vmmov 1  }
 0x131   : > { %v327_v51 = vpop.f32.mrb[0].mxu1 }
 0x132   : > { %332 = vst.msk [vmem:[#allocation2] sm:$0x1] %vm331_vm2, %v327_v51  ;;  %v1265_v52 = vpop.f32.mrb[1].mxu1 }
 0x133   : > { %v480_v53 = vpop.f32.mrb[0].mxu0 }
 0x134   : > { %484 = vst.msk [vmem:[#allocation2 + $0x2] sm:$0x1] %vm331_vm2, %v480_v53  ;;  %v1287_v54 = vpop.f32.mrb[1].mxu0 }
 0x139   : > { %v404_v55 = vpop.f32.mrb[2].mxu1 }
 0x13a   : > { %408 = vst.msk [vmem:[#allocation2 + $0x1] sm:$0x1] %vm331_vm2, %v404_v55  ;;  %v1276_v56 = vpop.f32.mrb[3].mxu1 }
 0x13b   : > { %v632_v57 = vpop.f32.mrb[2].mxu0 }
 0x13c   : > { %636 = vst.msk [vmem:[#allocation2 + $0x4] sm:$0x1] %vm331_vm2, %v632_v57  ;;  %v1309_v58 = vpop.f32.mrb[3].mxu0  ;;  %v886_v57 = vld [vmem:[%s2038_s3] sm:$0xff] }
 0x141   : > { %v556_v59 = vpop.f32.mrb[4].mxu1 }
 0x142   : > { %560 = vst.msk [vmem:[#allocation2 + $0x3] sm:$0x1] %vm331_vm2, %v556_v59  ;;  %v1298_v60 = vpop.f32.mrb[5].mxu1 }
 0x143   : > { %v784_v61 = vpop.f32.mrb[4].mxu0 }
 0x144   : > { %788 = vst.msk [vmem:[#allocation2 + $0x6] sm:$0x1] %vm331_vm2, %v784_v61  ;;  %v1331_v62 = vpop.f32.mrb[5].mxu0 }
 0x149   : > { %v708_v63 = vpop.f32.mrb[6].mxu1 }
 0x14a   : > { %712 = vst.msk [vmem:[#allocation2 + $0x5] sm:$0x1] %vm331_vm2, %v708_v63  ;;  %v1320_v2 = vpop.f32.mrb[7].mxu1 }
 0x151   : > { %v860_v3 = vpop.f32.mrb[8].mxu1 }
 0x152   : > { %864 = vst.msk [vmem:[#allocation2 + $0x7] sm:$0x1] %vm331_vm2, %v860_v3  ;;  %v1342_v4 = vpop.f32.mrb[9].mxu1  ;;  %vm1422_vm2 = vmpackc.low %vm1950_vm11, %vm1668_vm1 }
 0x159   : > { %v865_v6 = vld [vmem:[#allocation2] sm:$0xff] }
 0x15a   : > { %v867_v7 = vadd.f32 %v866_v5, %v865_v6 }
 0x15c   : > { %v869_v8 = vsel %vm868_vm3, %v867_v7, 0.0 }
 0x15d   : > { %870 = vadd.xlane.f32.xlu0 %v869_v8 }
 0x1ea   : > { %v871_v9 = vpop.xlane.xlu0 %870 }
 0x1eb   : > { %v873_v10 = vmul.f32 0.015625, %v871_v9 }
 0x1ed   : > { %v874_v11 = vsub.f32 %v867_v7, %v873_v10 }
 0x1ef   : > { %v875_v12 = vmul.f32 %v874_v11, %v874_v11 }
 0x1f1   : > { %v876_v13 = vsel %vm868_vm3, %v875_v12, 0.0 }
 0x1f2   : > { %877 = vadd.xlane.f32.xlu0 %v876_v13 }
 0x27f   : > { %v878_v14 = vpop.xlane.xlu0 %877 }
 0x280   : > { %v879_v15 = vmul.f32 0.015625, %v878_v14 }
 0x282   : > { %v880_v16 = vadd.f32 1e-05, %v879_v15 }
 0x284   : > { %1510 = vrsqrt.f32 %v880_v16 }
 0x28e   : > { %v1511_v17 = vpop.eup %1510 }
 0x28f   : > { %v882_v18 = vmul.f32 %v1511_v17, %v874_v11 }
 0x291   : > { %vm883_vm4 = vcmp.gt.f32.partialorder %v882_v18, 0.0  ;;  %v884_v19 = vmul.f32 0.2, %v882_v18 }
 0x293   : > { %v1914_v20 = vsel %vm883_vm4, %v882_v18, %v884_v19  ;;  %vm1964_vm4 = vcmp.le.s32.totalorder %v890_v25, 6 }
 0x294   : > { %907 = vrot.lane.b32.xlu0 %v1914_v20, %s1651_s13  ;;  %893 = vrot.lane.b32.xlu1 %v1914_v20, %s1652_s6  ;;  %s1667_s13 = smov 119  }
 0x298   : > { %945 = vrot.lane.b32.xlu0 %v1914_v20, %s1653_s7  ;;  %896 = vrot.lane.b32.xlu1 %v1914_v20, %s1654_s14 }
 0x29c   : > { %956 = vrot.lane.b32.xlu0 %v1914_v20, %s1655_s23  ;;  %910 = vrot.lane.b32.xlu1 %v1914_v20, %s1656_s27  ;;  %s1183_s27 = sshll.u32 %s1836_s15, 3 }
 0x2a0   : > { %969 = vrot.lane.b32.xlu0 %v1914_v20, %s1657_s11  ;;  %918 = vrot.lane.b32.xlu1 %v1914_v20, %s1658_s10  ;;  %s1202_s11 = sshll.u32 %s1721_s22, 7  ;;  %s251_s10 = scalar_lea.vmem [#allocation8], %s1183_s27 }
 0x2a1   : > { %s1669_s22 = smov [#allocation8]  }
 0x2a4   : > { %980 = vrot.lane.b32.xlu0 %v1914_v20, %s1659_s12  ;;  %921 = vrot.lane.b32.xlu1 %v1914_v20, %s1660_s29  ;;  %s1099_s12 = sshll.u32 %s251_s10, 4  ;;  %s1992_s12 = int_to_ptr.vmem [resolvable:$true] %s1099_s12 }
 0x2a8   : > { %931 = vrot.lane.b32.xlu1 %v1914_v20, %s1661_s28 }
 0x2ac   : > { %934 = vrot.lane.b32.xlu1 %v1914_v20, %s1662_s16  ;;  %s1990_s16 = scalar_lea.hbm %s2040_s5, %s1202_s11 }
 0x2b0   : > { %942 = vrot.lane.b32.xlu1 %v1914_v20, %s1663_s17  ;;  %s1086_s17 = scalar_lea.sflag [#allocation5], %s1836_s15 }
 0x2b4   : > { %953 = vrot.lane.b32.xlu1 %v1914_v20, %s1664_s24  ;;  %s1572_s24 = scalar_lea.vmem %s1992_s12, 128 }
 0x2b5   : > { %p1573_p4 = scmp.ne.s32.totalorder %s1992_s12, %s1572_s24 }
 0x2b7   : > { %p1574_p6 = pnand %p1573_p4, %p1791_p12 }
 0x2b8   : > { %966 = vrot.lane.b32.xlu1 %v1914_v20, %s1666_s26  ;;  %s1576_s26 = sshll.u32 %s1669_s22, 4  ;;  %s1577_s26 = int_to_ptr.vmem [resolvable:$false] %s1576_s26 }
 0x2b9   : > { %p1575_p8 = pneg %p1574_p6  ;;  %p1579_p10 = scmp.lt.s32.totalorder %s1992_s12, %s1577_s26 }
 0x2bc   : > { %977 = vrot.lane.b32.xlu1 %v1914_v20, %s1667_s13  ;;  %s1578_s13 = scalar_lea.vmem %s1577_s26, 256 }
 0x2bd   : > { %p1580_p13 = scmp.lt.s32.totalorder %s1578_s13, %s1572_s24 }
 0x2bf   : > { %p1581_p3 = por %p1580_p13, %p1579_p10 }
 0x2c0   : > { %991 = vperm.xlu1 %1508, %v887_v22  }
 0x2c1   : > { %p1582_p7 = pnand %p1581_p3, %p1575_p8 }
 0x306   : > { %v894_v27 = vpop.permute.xlu1 %893  ;;  %v908_v31 = vpop.permute.xlu0 %907 }
 0x30a   : > { %v897_v30 = vpop.permute.xlu1 %896  ;;  %v946_v40 = vpop.permute.xlu0 %945 }
 0x30b   : > { %v900_v33 = vsel %vm899_vm7, %v894_v27, %v897_v30  ;;  %vm972_vm7 = vcmask 457728  }
 0x30e   : > { %v911_v32 = vpop.permute.xlu1 %910  ;;  %v957_v47 = vpop.permute.xlu0 %956 }
 0x30f   : > { %v914_v34 = vsel %vm913_vm8, %v908_v31, %v911_v32  ;;  %vm962_vm8 = vmand %vm1964_vm4, %vm1939_vm6  ;;  %vm994_vm6 = vcmask 588800  }
 0x310   : > { %v1413_v35 = vpack.c.bf16 %v914_v34, %v900_v33  ;;  %vm1426_vm9 = vmpackc.low %vm1964_vm4, %vm962_vm8 }
 0x312   : > { %1415 = vmatpush3.bf16.msk.msra.mxu0 %vm1414_vm10, %v1413_v35  ;;  %v919_v36 = vpop.permute.xlu1 %918  ;;  %v970_v51 = vpop.permute.xlu0 %969  ;;  %vm983_vm10 = vcmask 449536  }
 0x313   : > { %1416 = vmatprep.subr.bf16.mxu0 %v1648_v0 }
 0x316   : > { %v922_v37 = vpop.permute.xlu1 %921 }
 0x317   : > { %v925_v42 = vsel %vm924_vm12, %v919_v36, %v922_v37  ;;  %vm985_vm12 = vmand %vm1964_vm4, %vm1950_vm11 }
 0x31a   : > { %v932_v39 = vpop.permute.xlu1 %931 }
 0x31e   : > { %v935_v41 = vpop.permute.xlu1 %934 }
 0x31f   : > { %v938_v43 = vsel %vm937_vm13, %v932_v39, %v935_v41 }
 0x320   : > { %v1417_v44 = vpack.c.bf16 %v938_v43, %v925_v42 }
 0x322   : > { %1419 = vmatpush3.bf16.msk.msra.mxu0 %vm1418_vm15, %v1417_v44  ;;  %v943_v45 = vpop.permute.xlu1 %942 }
 0x323   : > { %v949_v46 = vsel %vm948_vm0, %v943_v45, %v946_v40  ;;  %1420 = vmatprep.subr.bf16.mxu0 %v1648_v0 }
 0x324   : > { %v1421_v48 = vpack.c.bf16 %v949_v46, %v1914_v20 }
 0x326   : > { %1423 = vmatpush3.bf16.msk.msra.mxu0 %vm1422_vm2, %v1421_v48  ;;  %v954_v50 = vpop.permute.xlu1 %953 }
 0x327   : > { %1424 = vmatprep.subr.bf16.mxu0 %v1648_v0  ;;  %v960_v53 = vsel %vm959_vm5, %v954_v50, %v957_v47  ;;  %v981_v0 = vpop.permute.xlu0 %980 }
 0x32a   : > { %v967_v52 = vpop.permute.xlu1 %966 }
 0x32b   : > { %v973_v54 = vsel %vm972_vm7, %v967_v52, %v970_v51 }
 0x32c   : > { %v1425_v55 = vpack.c.bf16 %v973_v54, %v960_v53 }
 0x32e   : > { %1427 = vmatpush3.bf16.msk.msra.mxu0 %vm1426_vm9, %v1425_v55  ;;  %v978_v56 = vpop.permute.xlu1 %977 }
 0x32f   : > { %1359 = vmatprep.subr.mxu0 %v1650_v1  ;;  %v984_v58 = vsel %vm983_vm10, %v978_v56, %v981_v0 }
 0x332   : > { %1360 = vmatpush3.msk.msra.mxu0 %vm985_vm12, %v984_v58 }
 0x333   : > { %1362 = vmatmul.mubr.msk.f32.vlgmr.msra.gmra.mrb[6].mxu0 %vm994_vm6, %v886_v57 }
 0x33f   : > { %v992_v59 = vpop.permute.xlu1 %991 }
 0x406   : > { %v1064_v60 = vpop.f32.mrb[6].mxu0 }
 0x407   : > { %v1065_v61 = vadd.f32 %v1064_v60, %v992_v59  ;;  %v1363_v62 = vpop.f32.mrb[7].mxu0 }
 0x409   : > { %v1068_v1 = vsel %vm868_vm3, %v1065_v61, 0.0 }
 0x40a   : > { %1069 = vadd.xlane.f32.xlu0 %v1068_v1 }
 0x497   : > { %v1070_v63 = vpop.xlane.xlu0 %1069 }
 0x498   : > { %v1071_v2 = vmul.f32 0.015625, %v1070_v63 }
 0x49a   : > { %v1072_v3 = vsub.f32 %v1065_v61, %v1071_v2 }
 0x49c   : > { %v1073_v4 = vmul.f32 %v1072_v3, %v1072_v3 }
 0x49e   : > { %v1074_v5 = vsel %vm868_vm3, %v1073_v4, 0.0 }
 0x49f   : > { %1075 = vadd.xlane.f32.xlu1 %v1074_v5 }
 0x52c   : > { %v1076_v6 = vpop.xlane.xlu1 %1075 }
 0x52d   : > { %v1077_v7 = vmul.f32 0.015625, %v1076_v6 }
 0x52f   : > { %v1078_v8 = vadd.f32 1e-05, %v1077_v7 }
 0x531   : > { %1512 = vrsqrt.f32 %v1078_v8 }
 0x53b   : > { %v1513_v9 = vpop.eup %1512 }
 0x53c   : > { %v1080_v10 = vmul.f32 %v1513_v9, %v1072_v3 }
 0x53e   : > { %vm1081_vm11 = vcmp.gt.f32.partialorder %v1080_v10, 0.0  ;;  %v1082_v11 = vmul.f32 0.2, %v1080_v10 }
 0x540   : > { %v1083_v12 = vsel %vm1081_vm11, %v1080_v10, %v1082_v11 }
 0x541   : > { %1084 = vst.msk [vmem:[%s251_s10] sm:$0xff] %vm868_vm3, %v1083_v12 }
 0x542   : > { %1585 = shalt.err (!%p1582_p7)
}
 0x543   : > { %s1586_s15 = scalar_lea.hbm %s1990_s16, 128  ;;  %s1590_s14 = scalar_lea.hbm %s2040_s5, 256 }
 0x544   : > { %p1587_p9 = scmp.ne.s32.totalorder %s1990_s16, %s1586_s15  ;;  %p1591_p0 = scmp.lt.u32.totalorder %s1990_s16, %s2040_s5 }
 0x545   : > { %p1592_p1 = scmp.lt.u32.totalorder %s1590_s14, %s1586_s15  ;;  %p1594_p4 = scmp.lt.u32.totalorder %s1586_s15, %s1990_s16 }
 0x546   : > { %p1588_p2 = pnand %p1587_p9, %p1791_p12 }
 0x547   : > { %p1593_p11 = por %p1592_p1, %p1591_p0 }
 0x548   : > { %p1589_p5 = pneg %p1588_p2 }
 0x549   : > { %p1595_p6 = por %p1594_p4, %p1593_p11 }
 0x54b   : > { %p1596_p8 = pnand %p1595_p6, %p1589_p5 }
 0x54d   : > { %1599 = shalt.err (!%p1596_p8)
}
 0x54e   : > { %1434 = dma.vmem_to_hbm [thread:$0]  (%p1791_p12), %s1992_s12, 128, %s1990_s16, %s1086_s17  }
 0x54f PF: > { %s1111_s11 = sand.u32 1, %s1630_s18   ;;  %p2063_p10 = scmp.ne.s32.totalorder %s2045_s25, 0 }
 0x550   : > { %p2064_p13 = scmp.ge.s32.totalorder %s1642_s21, 2  ;;  %s1112_s10 = scalar_lea.sflag [#allocation5], %s1111_s11 }
 0x552   : > { %p1445_p3 = pnand %p2064_p13, %p2063_p10 }
 0x554   : > { %1625 = dma.done.wait (!%p1445_p3), %s1112_s10, 128  }
 0x555   : > { %1627 = vsyncadd (!%p1445_p3), %s1112_s10, 4294967168  ;;  %p19_p7 = scmp.ge.s32.totalorder %s1756_s30, 4   ;;  %s2065_s18 = smov %s1634_s19 }
 0x556   : > { %s2066_s19 = smov %s1638_s20  ;;  %s2067_s20 = smov %s1787_s8 }
 0x557   : > { %s2068_s21 = smov %s1756_s30  ;;  %21 = sbr.rel (!%p19_p7) target bundleno = 6 (0x6), region = 96 }
 0x55e   :  { %1117 = vsyncpa [#allocation4], 1 }
 0x55f   :  { %1119 = vsyncpa [#allocation4 + $0x1], 1 }
 0x560   :  { %1120 = vsyncpa [#allocation7], 1 }
 0x561   :  { %1121 = vsyncpa [#allocation5], 1 }
 0x562   :  { %1123 = vsyncpa [#allocation5 + $0x1], 1 }

</bundles_post_ra>
